<compile_context>
chip_gen: v7x
topology: tpu7x:2x2x1
jax: 0.10.0
libtpu: 0.0.40
codegen_flags: <defaults>
</compile_context>

<pallas_src>
import functools

import numpy as np
import jax
import jax.numpy as jnp
from jax import lax
from jax.experimental import pallas as pl
from jax.experimental.pallas import tpu as pltpu

NUM_IN = 32      # num_in
PLANE_MID = 16   # num_s
MIDS = 4         # num_n = MIDS * MIDS


# ----------------------------------------------------------------------------
# constant-operator construction (host side, numpy at trace time)
# ----------------------------------------------------------------------------
def _adaptive_pool_matrix(h, w, mids):
    """(mids*mids, h*w) operator P so that  x_anchor = x_mask_flat @ P.T.

    Equals PyTorch AdaptiveAvgPool2d((mids+2, mids+2)) followed by the
    [1:-1, 1:-1] crop, folded into a single constant matmul.
    """
    out = mids + 2

    def win(size, i):
        return (i * size) // out, ((i + 1) * size + out - 1) // out

    P = np.zeros((mids * mids, h * w), np.float32)
    for ii in range(1, mids + 1):
        rs, re = win(h, ii)
        for jj in range(1, mids + 1):
            cs, ce = win(w, jj)
            node = (ii - 1) * mids + (jj - 1)
            val = 1.0 / ((re - rs) * (ce - cs))
            for r in range(rs, re):
                P[node, r * w + cs:r * w + ce] = val
    return jnp.asarray(P)


def _upsample_nearest(e, h, w):
    """PyTorch F.upsample / F.interpolate(mode='nearest') to (h, w)."""
    n, c, he, we = e.shape
    ri = (jnp.arange(h) * he) // h
    ci = (jnp.arange(w) * we) // w
    return e[:, :, ri[:, None], ci[None, :]]


# ----------------------------------------------------------------------------
# Pallas kernel: one batch element per grid step
# ----------------------------------------------------------------------------
def sam_kernel(x_ref, edge_ref, pool_ref, wsp_ref, bsp_ref,
               w1_ref, b1_ref, w2_ref, wext_ref, o_ref, *, num_s, normalize):
    dot = functools.partial(jnp.dot, preferred_element_type=jnp.float32)

    def dot_t(a, b):  # a @ b.T without an explicit transpose
        return lax.dot_general(a, b, (((1,), (1,)), ((), ())),
                               preferred_element_type=jnp.float32)

    X = x_ref[0]                                   # (C, HW)
    E = edge_ref[0]                                # (E_ch, HW) edge logits

    # softmax over edge channels, keep channel 1 (foreground probability)
    em = jnp.max(E, axis=0, keepdims=True)
    ee = jnp.exp(E - em)
    edge1 = ee[1:2, :] / jnp.sum(ee, axis=0, keepdims=True)        # (1, HW)

    # conv_state + conv_proj (two 1x1 convs) fused into ONE channel matmul
    xsp = dot(wsp_ref[...], X) + bsp_ref[...]                      # (2S, HW)
    xs = xsp[:num_s]                                               # x_state (S, HW)
    xp = xsp[num_s:]                                               # x_proj  (S, HW)
    xm = xp * edge1                                                # (S, HW)

    # adaptive avg-pool (6x6) + [1:-1,1:-1] crop as one constant matmul.
    # anchor_t[n, s] = sum_p pool[n, p] * xm[s, p]   -> x_anchor^T  (N, S)
    anchor_t = dot_t(pool_ref[...], xm)                            # (N, S)

    # projection matrix and softmax over the node axis (dim=1 in torch)
    proj = dot(anchor_t, xp)                                       # (N, HW)
    pm = jnp.max(proj, axis=0, keepdims=True)
    pe = jnp.exp(proj - pm)
    proj = pe / jnp.sum(pe, axis=0, keepdims=True)                 # (N, HW)

    # x_n_state = x_state @ proj^T
    xn = dot_t(xs, proj)                                           # (S, N)
    if normalize:
        xn = xn * (1.0 / X.shape[1])

    # GCN: relu(W2 @ (xn @ W1^T + b1 - xn))
    h1 = dot_t(xn, w1_ref[...]) + b1_ref[...] - xn                 # (S, N)
    xrel = jnp.maximum(dot(w2_ref[...], h1), 0.0)                  # (S, N)

    # conv_extend folded before back-projection:
    #   wext @ (xrel @ proj) == (wext @ xrel) @ proj
    wx = dot(wext_ref[...], xrel)                                  # (C, N)
    o_ref[0] = X + dot(wx, proj)                                   # (C, HW)


def sam_forward(x, edge, params, mids=MIDS, normalize=False):
    ws, bs, wp, bp, w1, b1, w2, wext = params
    n, c, h, w = x.shape
    hw = h * w
    num_s = ws.shape[0]
    e_ch = edge.shape[1]

    xf = x.reshape(n, c, hw).astype(jnp.float32)
    # nearest upsample of edge logits is pure index plumbing -> wrapper.
    ef = _upsample_nearest(edge, h, w).reshape(n, e_ch, hw).astype(jnp.float32)
    pool = _adaptive_pool_matrix(h, w, mids)                       # (N, HW)

    # stacked conv_state / conv_proj -> single MXU matmul inside the kernel
    wsp = jnp.concatenate([ws, wp], axis=0).astype(jnp.float32)            # (2S, C)
    bsp = jnp.concatenate([bs, bp], axis=0).reshape(2 * num_s, 1)
    bsp = bsp.astype(jnp.float32)                                          # (2S, 1)
    w1f = w1.astype(jnp.float32)
    b12 = b1.reshape(1, -1).astype(jnp.float32)                            # (1, N)
    w2f = w2.astype(jnp.float32)
    wextf = wext.astype(jnp.float32)

    def const_spec(arr):
        nd = arr.ndim
        return pl.BlockSpec(arr.shape, lambda i, nd=nd: (0,) * nd)

    kern = functools.partial(sam_kernel, num_s=num_s, normalize=normalize)

    out = pl.pallas_call(
        kern,
        out_shape=jax.ShapeDtypeStruct((n, c, hw), jnp.float32),
        grid=(n,),
        in_specs=[
            pl.BlockSpec((1, c, hw), lambda i: (i, 0, 0)),          # x
            pl.BlockSpec((1, e_ch, hw), lambda i: (i, 0, 0)),       # edge logits
            const_spec(pool),                                       # pool operator
            const_spec(wsp), const_spec(bsp),                       # stacked 1x1 convs
            const_spec(w1f), const_spec(b12),                       # gcn conv1
            const_spec(w2f),                                        # gcn conv2
            const_spec(wextf),                                      # conv_extend
        ],
        out_specs=pl.BlockSpec((1, c, hw), lambda i: (i, 0, 0)),
        compiler_params=pltpu.CompilerParams(
            dimension_semantics=("parallel",)),
    )(xf, ef, pool, wsp, bsp, w1f, b12, w2f, wextf)
    return out.reshape(n, c, h, w)


# ----------------------------------------------------------------------------
# parameters & pure-JAX reference (mirrors the PyTorch forward)
# ----------------------------------------------------------------------------
def make_params(key, num_in=NUM_IN, num_s=PLANE_MID, mids=MIDS):
    num_n = mids * mids
    ks = jax.random.split(key, 8)
    s = 0.1
    ws = s * jax.random.normal(ks[0], (num_s, num_in), jnp.float32)   # conv_state
    bs = s * jax.random.normal(ks[1], (num_s,), jnp.float32)
    wp = s * jax.random.normal(ks[2], (num_s, num_in), jnp.float32)   # conv_proj
    bp = s * jax.random.normal(ks[3], (num_s,), jnp.float32)
    w1 = s * jax.random.normal(ks[4], (num_n, num_n), jnp.float32)    # GCN conv1 (node mix)
    b1 = s * jax.random.normal(ks[5], (num_n,), jnp.float32)
    w2 = s * jax.random.normal(ks[6], (num_s, num_s), jnp.float32)    # GCN conv2 (no bias)
    wext = s * jax.random.normal(ks[7], (num_in, num_s), jnp.float32) # conv_extend (no bias)
    return ws, bs, wp, bp, w1, b1, w2, wext


def _adaptive_avg_pool(v, out_size):
    n, c, h, w = v.shape
    rows = []
    for i in range(out_size):
        rs, re = (i * h) // out_size, ((i + 1) * h + out_size - 1) // out_size
        cols = []
        for j in range(out_size):
            cs, ce = (j * w) // out_size, ((j + 1) * w + out_size - 1) // out_size
            cols.append(jnp.mean(v[:, :, rs:re, cs:ce], axis=(2, 3)))
        rows.append(jnp.stack(cols, axis=-1))
    return jnp.stack(rows, axis=-2)


def ref_forward(x, edge, params, mids=MIDS, normalize=False):
    ws, bs, wp, bp, w1, b1, w2, wext = params
    n, c, h, w = x.shape
    num_s = ws.shape[0]

    e_up = _upsample_nearest(edge, h, w)
    e1 = jax.nn.softmax(e_up, axis=1)[:, 1:2]                       # (n,1,h,w)

    def conv1x1(v, wgt, b=None):
        o = jnp.einsum('os,nshw->nohw', wgt, v)
        return o if b is None else o + b.reshape(1, -1, 1, 1)

    x_state = conv1x1(x, ws, bs).reshape(n, num_s, -1)              # (n,S,HW)
    x_proj = conv1x1(x, wp, bp)                                     # (n,S,h,w)
    x_mask = x_proj * e1
    anchor = _adaptive_avg_pool(x_mask, mids + 2)[:, :, 1:-1, 1:-1]
    anchor = anchor.reshape(n, num_s, -1)                           # (n,S,N)
    xpr = x_proj.reshape(n, num_s, -1)
    proj = jnp.einsum('nsk,nsp->nkp', anchor, xpr)                  # (n,N,HW)
    proj = jax.nn.softmax(proj, axis=1)
    xn = jnp.einsum('nsp,nkp->nsk', x_state, proj)                  # (n,S,N)
    if normalize:
        xn = xn * (1.0 / x_state.shape[2])
    h1 = jnp.einsum('nsk,jk->nsj', xn, w1) + b1.reshape(1, 1, -1) - xn
    xrel = jax.nn.relu(jnp.einsum('os,nsk->nok', w2, h1))
    xs2 = jnp.einsum('nsk,nkp->nsp', xrel, proj).reshape(n, num_s, h, w)
    return x + conv1x1(xs2, wext)


if __name__ == "__main__":
    key = jax.random.PRNGKey(0)
    kx, ke, kp = jax.random.split(key, 3)
    n, c, h, w = 2, NUM_IN, 16, 16
    x = jax.random.normal(kx, (n, c, h, w), jnp.float32)
    edge = jax.random.normal(ke, (n, 2, h // 2, w // 2), jnp.float32)
    params = make_params(kp)

    out = jax.block_until_ready(sam_forward(x, edge, params))
    ref = ref_forward(x, edge, params)

    assert out.shape == (n, c, h, w), out.shape
    max_err = float(jnp.max(jnp.abs(out - ref)))
    assert max_err < 2e-3, f"max abs error vs reference: {max_err}"
    print("KERNEL_OK")
</pallas_src>

<mosaic_0001>
module attributes {stable_mosaic.version = 11 : i64} {
  func.func @sam_kernel(%arg0: i32, %arg1: memref<1x32x256xf32, #tpu.memory_space<vmem>>, %arg2: memref<1x2x256xf32, #tpu.memory_space<vmem>>, %arg3: memref<16x256xf32, #tpu.memory_space<vmem>>, %arg4: memref<32x32xf32, #tpu.memory_space<vmem>>, %arg5: memref<32x1xf32, #tpu.memory_space<vmem>>, %arg6: memref<16x16xf32, #tpu.memory_space<vmem>>, %arg7: memref<1x16xf32, #tpu.memory_space<vmem>>, %arg8: memref<16x16xf32, #tpu.memory_space<vmem>>, %arg9: memref<32x16xf32, #tpu.memory_space<vmem>>, %arg10: memref<1x32x256xf32, #tpu.memory_space<vmem>>) attributes {dimension_semantics = [#tpu.dimension_semantics<parallel>], iteration_bounds = array<i64: 2>, scalar_prefetch = 0 : i64, scratch_operands = 0 : i64, tpu.core_type = #tpu.core_type<tc>, window_params = [{transform_indices = @transform_0, window_bounds = array<i64: 1, 32, 256>}, {transform_indices = @transform_1, window_bounds = array<i64: 1, 2, 256>}, {pipeline_mode = #tpu.pipeline_mode<synchronous>, transform_indices = @transform_2, window_bounds = array<i64: 16, 256>}, {pipeline_mode = #tpu.pipeline_mode<synchronous>, transform_indices = @transform_3, window_bounds = array<i64: 32, 32>}, {pipeline_mode = #tpu.pipeline_mode<synchronous>, transform_indices = @transform_4, window_bounds = array<i64: 32, 1>}, {pipeline_mode = #tpu.pipeline_mode<synchronous>, transform_indices = @transform_5, window_bounds = array<i64: 16, 16>}, {pipeline_mode = #tpu.pipeline_mode<synchronous>, transform_indices = @transform_6, window_bounds = array<i64: 1, 16>}, {pipeline_mode = #tpu.pipeline_mode<synchronous>, transform_indices = @transform_7, window_bounds = array<i64: 16, 16>}, {pipeline_mode = #tpu.pipeline_mode<synchronous>, transform_indices = @transform_8, window_bounds = array<i64: 32, 16>}, {transform_indices = @transform_9, window_bounds = array<i64: 1, 32, 256>}]} {
    %c0 = arith.constant 0 : index
    %c0_0 = arith.constant 0 : index
    %c0_1 = arith.constant 0 : index
    %0 = vector.load %arg1[%c0, %c0_0, %c0_1] : memref<1x32x256xf32, #tpu.memory_space<vmem>>, vector<1x32x256xf32>
    %1 = vector.shape_cast %0 : vector<1x32x256xf32> to vector<32x256xf32>
    %c0_2 = arith.constant 0 : index
    %c0_3 = arith.constant 0 : index
    %c0_4 = arith.constant 0 : index
    %2 = vector.load %arg2[%c0_2, %c0_3, %c0_4] : memref<1x2x256xf32, #tpu.memory_space<vmem>>, vector<1x2x256xf32>
    %3 = vector.shape_cast %2 : vector<1x2x256xf32> to vector<2x256xf32>
    %cst = arith.constant dense<0xFF800000> : vector<256xf32>
    %4 = vector.multi_reduction <maximumf>, %3, %cst [0] : vector<2x256xf32> to vector<256xf32>
    %5 = vector.shape_cast %4 : vector<256xf32> to vector<1x256xf32>
    %6 = vector.broadcast %5 : vector<1x256xf32> to vector<2x256xf32>
    %7 = arith.subf %3, %6 : vector<2x256xf32>
    %8 = math.exp %7 : vector<2x256xf32>
    %9 = vector.extract_strided_slice %8 {offsets = [1, 0], sizes = [1, 256], strides = [1, 1]} : vector<2x256xf32> to vector<1x256xf32>
    %cst_5 = arith.constant dense<0.000000e+00> : vector<256xf32>
    %10 = vector.multi_reduction <add>, %8, %cst_5 [0] : vector<2x256xf32> to vector<256xf32>
    %11 = vector.shape_cast %10 : vector<256xf32> to vector<1x256xf32>
    %12 = arith.divf %9, %11 : vector<1x256xf32>
    %c0_6 = arith.constant 0 : index
    %c0_7 = arith.constant 0 : index
    %13 = vector.load %arg4[%c0_6, %c0_7] : memref<32x32xf32, #tpu.memory_space<vmem>>, vector<32x32xf32>
    %cst_8 = arith.constant dense<0.000000e+00> : vector<32x256xf32>
    %14 = tpu.matmul %13, %1, %cst_8 {dimension_numbers = #tpu.dot_dimension_numbers<[1], [0], [0], [1], [0, 0, 1, 1], [], []>} : vector<32x32xf32>, vector<32x256xf32>, vector<32x256xf32> -> vector<32x256xf32>
    %c0_9 = arith.constant 0 : index
    %c0_10 = arith.constant 0 : index
    %15 = vector.load %arg5[%c0_9, %c0_10] : memref<32x1xf32, #tpu.memory_space<vmem>>, vector<32x1xf32>
    %16 = vector.broadcast %15 : vector<32x1xf32> to vector<32x256xf32>
    %17 = arith.addf %14, %16 : vector<32x256xf32>
    %18 = vector.extract_strided_slice %17 {offsets = [0, 0], sizes = [16, 256], strides = [1, 1]} : vector<32x256xf32> to vector<16x256xf32>
    %19 = vector.extract_strided_slice %17 {offsets = [16, 0], sizes = [16, 256], strides = [1, 1]} : vector<32x256xf32> to vector<16x256xf32>
    %20 = vector.broadcast %12 : vector<1x256xf32> to vector<16x256xf32>
    %21 = arith.mulf %19, %20 : vector<16x256xf32>
    %c0_11 = arith.constant 0 : index
    %c0_12 = arith.constant 0 : index
    %22 = vector.load %arg3[%c0_11, %c0_12] : memref<16x256xf32, #tpu.memory_space<vmem>>, vector<16x256xf32>
    %cst_13 = arith.constant dense<0.000000e+00> : vector<16x16xf32>
    %23 = tpu.matmul %22, %21, %cst_13 {dimension_numbers = #tpu.dot_dimension_numbers<[1], [1], [0], [0], [0, 0, 1, 0], [], []>} : vector<16x256xf32>, vector<16x256xf32>, vector<16x16xf32> -> vector<16x16xf32>
    %cst_14 = arith.constant dense<0.000000e+00> : vector<16x256xf32>
    %24 = tpu.matmul %23, %19, %cst_14 {dimension_numbers = #tpu.dot_dimension_numbers<[1], [0], [0], [1], [0, 0, 1, 1], [], []>} : vector<16x16xf32>, vector<16x256xf32>, vector<16x256xf32> -> vector<16x256xf32>
    %cst_15 = arith.constant dense<0xFF800000> : vector<256xf32>
    %25 = vector.multi_reduction <maximumf>, %24, %cst_15 [0] : vector<16x256xf32> to vector<256xf32>
    %26 = vector.shape_cast %25 : vector<256xf32> to vector<1x256xf32>
    %27 = vector.broadcast %26 : vector<1x256xf32> to vector<16x256xf32>
    %28 = arith.subf %24, %27 : vector<16x256xf32>
    %29 = math.exp %28 : vector<16x256xf32>
    %cst_16 = arith.constant dense<0.000000e+00> : vector<256xf32>
    %30 = vector.multi_reduction <add>, %29, %cst_16 [0] : vector<16x256xf32> to vector<256xf32>
    %31 = vector.shape_cast %30 : vector<256xf32> to vector<1x256xf32>
    %32 = vector.broadcast %31 : vector<1x256xf32> to vector<16x256xf32>
    %33 = arith.divf %29, %32 : vector<16x256xf32>
    %cst_17 = arith.constant dense<0.000000e+00> : vector<16x16xf32>
    %34 = tpu.matmul %18, %33, %cst_17 {dimension_numbers = #tpu.dot_dimension_numbers<[1], [1], [0], [0], [0, 0, 1, 0], [], []>} : vector<16x256xf32>, vector<16x256xf32>, vector<16x16xf32> -> vector<16x16xf32>
    %c0_18 = arith.constant 0 : index
    %c0_19 = arith.constant 0 : index
    %35 = vector.load %arg6[%c0_18, %c0_19] : memref<16x16xf32, #tpu.memory_space<vmem>>, vector<16x16xf32>
    %cst_20 = arith.constant dense<0.000000e+00> : vector<16x16xf32>
    %36 = tpu.matmul %34, %35, %cst_20 {dimension_numbers = #tpu.dot_dimension_numbers<[1], [1], [0], [0], [0, 0, 1, 0], [], []>} : vector<16x16xf32>, vector<16x16xf32>, vector<16x16xf32> -> vector<16x16xf32>
    %c0_21 = arith.constant 0 : index
    %c0_22 = arith.constant 0 : index
    %37 = vector.load %arg7[%c0_21, %c0_22] : memref<1x16xf32, #tpu.memory_space<vmem>>, vector<1x16xf32>
    %38 = vector.broadcast %37 : vector<1x16xf32> to vector<16x16xf32>
    %39 = arith.addf %36, %38 : vector<16x16xf32>
    %40 = arith.subf %39, %34 : vector<16x16xf32>
    %c0_23 = arith.constant 0 : index
    %c0_24 = arith.constant 0 : index
    %41 = vector.load %arg8[%c0_23, %c0_24] : memref<16x16xf32, #tpu.memory_space<vmem>>, vector<16x16xf32>
    %cst_25 = arith.constant dense<0.000000e+00> : vector<16x16xf32>
    %42 = tpu.matmul %41, %40, %cst_25 {dimension_numbers = #tpu.dot_dimension_numbers<[1], [0], [0], [1], [0, 0, 1, 1], [], []>} : vector<16x16xf32>, vector<16x16xf32>, vector<16x16xf32> -> vector<16x16xf32>
    %cst_26 = arith.constant 0.000000e+00 : f32
    %43 = vector.broadcast %cst_26 : f32 to vector<16x16xf32>
    %44 = arith.maximumf %42, %43 : vector<16x16xf32>
    %c0_27 = arith.constant 0 : index
    %c0_28 = arith.constant 0 : index
    %45 = vector.load %arg9[%c0_27, %c0_28] : memref<32x16xf32, #tpu.memory_space<vmem>>, vector<32x16xf32>
    %cst_29 = arith.constant dense<0.000000e+00> : vector<32x16xf32>
    %46 = tpu.matmul %45, %44, %cst_29 {dimension_numbers = #tpu.dot_dimension_numbers<[1], [0], [0], [1], [0, 0, 1, 1], [], []>} : vector<32x16xf32>, vector<16x16xf32>, vector<32x16xf32> -> vector<32x16xf32>
    %cst_30 = arith.constant dense<0.000000e+00> : vector<32x256xf32>
    %47 = tpu.matmul %46, %33, %cst_30 {dimension_numbers = #tpu.dot_dimension_numbers<[1], [0], [0], [1], [0, 0, 1, 1], [], []>} : vector<32x16xf32>, vector<16x256xf32>, vector<32x256xf32> -> vector<32x256xf32>
    %48 = arith.addf %1, %47 : vector<32x256xf32>
    %c0_31 = arith.constant 0 : index
    %c0_32 = arith.constant 0 : index
    %c0_33 = arith.constant 0 : index
    %49 = vector.load %arg10[%c0_31, %c0_32, %c0_33] : memref<1x32x256xf32, #tpu.memory_space<vmem>>, vector<1x32x256xf32>
    %50 = vector.shape_cast %49 : vector<1x32x256xf32> to vector<32x256xf32>
    %51 = vector.shape_cast %48 : vector<32x256xf32> to vector<1x32x256xf32>
    tpu.vector_store %arg10[%c0_31, %c0_32, %c0_33], %51 {strides = array<i32>} : memref<1x32x256xf32, #tpu.memory_space<vmem>>, vector<1x32x256xf32>,
    return
  }
  func.func @transform_0(%arg0: i32) -> (i32, i32, i32) {
    %c0_i32 = arith.constant 0 : i32
    %c0_i32_0 = arith.constant 0 : i32
    %c0_i32_1 = arith.constant 0 : i32
    return %arg0, %c0_i32, %c0_i32_0 : i32, i32, i32
  }
  func.func @transform_1(%arg0: i32) -> (i32, i32, i32) {
    %c0_i32 = arith.constant 0 : i32
    %c0_i32_0 = arith.constant 0 : i32
    %c0_i32_1 = arith.constant 0 : i32
    return %arg0, %c0_i32, %c0_i32_0 : i32, i32, i32
  }
  func.func @transform_2(%arg0: i32) -> (i32, i32) {
    %c0_i32 = arith.constant 0 : i32
    %c0_i32_0 = arith.constant 0 : i32
    %c0_i32_1 = arith.constant 0 : i32
    return %c0_i32, %c0_i32_0 : i32, i32
  }
  func.func @transform_3(%arg0: i32) -> (i32, i32) {
    %c0_i32 = arith.constant 0 : i32
    %c0_i32_0 = arith.constant 0 : i32
    %c0_i32_1 = arith.constant 0 : i32
    return %c0_i32, %c0_i32_0 : i32, i32
  }
  func.func @transform_4(%arg0: i32) -> (i32, i32) {
    %c0_i32 = arith.constant 0 : i32
    %c0_i32_0 = arith.constant 0 : i32
    %c0_i32_1 = arith.constant 0 : i32
    return %c0_i32, %c0_i32_0 : i32, i32
  }
  func.func @transform_5(%arg0: i32) -> (i32, i32) {
    %c0_i32 = arith.constant 0 : i32
    %c0_i32_0 = arith.constant 0 : i32
    %c0_i32_1 = arith.constant 0 : i32
    return %c0_i32, %c0_i32_0 : i32, i32
  }
  func.func @transform_6(%arg0: i32) -> (i32, i32) {
    %c0_i32 = arith.constant 0 : i32
    %c0_i32_0 = arith.constant 0 : i32
    %c0_i32_1 = arith.constant 0 : i32
    return %c0_i32, %c0_i32_0 : i32, i32
  }
  func.func @transform_7(%arg0: i32) -> (i32, i32) {
    %c0_i32 = arith.constant 0 : i32
    %c0_i32_0 = arith.constant 0 : i32
    %c0_i32_1 = arith.constant 0 : i32
    return %c0_i32, %c0_i32_0 : i32, i32
  }
  func.func @transform_8(%arg0: i32) -> (i32, i32) {
    %c0_i32 = arith.constant 0 : i32
    %c0_i32_0 = arith.constant 0 : i32
    %c0_i32_1 = arith.constant 0 : i32
    return %c0_i32, %c0_i32_0 : i32, i32
  }
  func.func @transform_9(%arg0: i32) -> (i32, i32, i32) {
    %c0_i32 = arith.constant 0 : i32
    %c0_i32_0 = arith.constant 0 : i32
    %c0_i32_1 = arith.constant 0 : i32
    return %arg0, %c0_i32, %c0_i32_0 : i32, i32, i32
  }
}

</mosaic_0001>

<bundles_post_ra>
// kernel: tpu_custom_call.1
= control target key start
LH: loop header
LB: loop body
LE: loop exit
PB: predicated region body
PF: predicated region fallthrough
CT: control target
= control target key end

     0   :  { %s2265_s0 = inlined_call_operand.hbm [shape: f32[2,32,256], index: 0, kind: input, shape index: {}]   ;;  %s2266_s1 = inlined_call_operand.hbm [shape: f32[2,2,256], index: 1, kind: input, shape index: {}]   ;;  %s2267_s2 = inlined_call_operand.vmem [shape: f32[16,256], index: 2, kind: input, shape index: {}]   ;;  %s2268_s3 = inlined_call_operand.vmem [shape: f32[32,32], index: 3, kind: input, shape index: {}]   ;;  %s2269_s4 = inlined_call_operand.vmem [shape: f32[32,1], index: 4, kind: input, shape index: {}]   ;;  %s2270_s5 = inlined_call_operand.vmem [shape: f32[16,16], index: 5, kind: input, shape index: {}]   ;;  %s2271_s6 = inlined_call_operand.vmem [shape: f32[1,16], index: 6, kind: input, shape index: {}]   ;;  %s2272_s7 = inlined_call_operand.hbm [shape: f32[16,16], index: 7, kind: input, shape index: {}]   ;;  %s2273_s8 = inlined_call_operand.vmem [shape: f32[32,16], index: 8, kind: input, shape index: {}]   ;;  %s2274_s9 = inlined_call_operand.hbm [shape: f32[2,32,256], index: 9, kind: output, shape index: {}]  }
   0x1   :  { %2284 = sst [smem:[#allocation18_spill]] %s2265_s0 }
   0x2   :  { %2285 = sst [smem:[#allocation19_spill]] %s2272_s7 }
   0x3   :  { %14 = vsyncpa [#allocation3], 0 }
   0x4   :  { %16 = vsyncpa [#allocation3 + $0x1], 0 }
   0x5   :  { %17 = vsyncpa [#allocation6], 0 }
   0x6   :  { %19 = vsyncpa [#allocation6 + $0x1], 0 }
   0x7   :  { %20 = vsyncpa [#allocation4], 0 }
   0x8   :  { %22 = vsyncpa [#allocation4 + $0x1], 0  ;;  %s1884_s30 = smov 0   ;;  %s1886_s10 = smov 0  }
   0x9   :  { %s1888_s11 = smov 0   ;;  %s1890_s12 = smov 0  }
   0xa LB: > { %2286 = sst [smem:[#allocation13_spill]] %s1807_s30  ;;  %s1905_s13 = sadd.s32 4294967295, %s1819_s12   ;;  %s1819_s12 = sphi %s1890_s12, %s2310_s12   ;;  %s1815_s11 = sphi %s1888_s11, %s2312_s11   ;;  %s1811_s10 = sphi %s1886_s10, %s2314_s10   ;;  %s1807_s30 = sphi %s1884_s30, %s2313_s30  }
   0xb   : > { %2287 = sst [smem:[#allocation14_spill]] %s1815_s11  ;;  %s1448_s14 = sadd.s32 4294967294, %s1819_s12  }
   0xc   : > { %p48_p0 = scmp.ne.s32.totalorder %s1811_s10, %s1807_s30  ;;  %p2275_p1 = scmp.eq.s32.totalorder %s1905_s13, 0 }
   0xd   : > { %p251_p3 = scmp.eq.s32.totalorder %s1448_s14, 1  ;;  %p1449_p5 = scmp.ge.s32.totalorder %s1819_s12, 1 }
   0xe   : > { %p1914_p4 = por %p2275_p1, %p48_p0  ;;  %p258_p7 = scmp.lt.s32.totalorder %s1819_s12, 3 }
   0xf   : > { %p1919_p6 = por %p251_p3, %p48_p0  ;;  %s1821_s18 = smov [#allocation7]  }
  0x10   : > { %s2288_s15 = scalar_select %p1914_p4, 1, 0 }
  0x11   : > { %s2289_s16 = scalar_select %p1919_p6, 1, 0 }
  0x12   : > { %p1924_p8 = pnand %p1449_p5, %p258_p7  ;;  %s285_s19 = sshll.u32 %s1821_s18, 4  ;;  %s1928_s19 = int_to_ptr.vmem [resolvable:$true] %s285_s19 }
  0x13   : > { %2290 = sst [smem:[#allocation15_spill]] %s2289_s16  ;;  %s1940_s21 = sadd.s32 1, %s1819_s12  }
  0x14   : > { %s2291_s17 = scalar_select %p1924_p8, 1, 0 }
  0x15   : > { %p1578_p9 = pneg %p1924_p8  ;;  %2293 = sst [smem:[#allocation16_spill]] %s1940_s21 }
  0x16   : > { %s35_s22 = sadd.s32 1, %s1815_s11  ;;  %s32_s23 = ssub.s32 %s1819_s12, %s1940_s21 }
  0x17   : > { %p1935_p11 = pnand %p1578_p9, %p2275_p1  ;;  %s2294_s7 = sld [smem:[#allocation19_spill]] }
  0x19   : > { %p1659_p13 = pneg %p1935_p11 }
  0x1d   : > { %s1657_s26 = scalar_lea.hbm %s2294_s7, 256 }
  0x1e   : > { %p1658_p12 = scmp.ne.s32.totalorder %s2294_s7, %s1657_s26  ;;  %p1664_p5 = scmp.lt.u32.totalorder %s1657_s26, %s2294_s7 }
  0x20   : > { %p1660_p0 = pnand %p1659_p13, %p1658_p12 }
  0x22   : > { %p1661_p3 = pneg %p1660_p0 }
  0x24   : > { %p1666_p7 = pnand %p1664_p5, %p1661_p3 }
  0x26   : > { %1669 = shalt.err (!%p1666_p7)
}
  0x27   : > { %s1670_s18 = scalar_lea.vmem %s1928_s19, 256  ;;  %p1678_p2 = scmp.lt.s32.totalorder %s1928_s19, %s1928_s19 }
  0x28   : > { %p1671_p9 = scmp.ne.s32.totalorder %s1928_s19, %s1670_s18  ;;  %p1679_p6 = scmp.lt.s32.totalorder %s1670_s18, %s1670_s18 }
  0x2a   : > { %p1673_p10 = pnand %p1671_p9, %p1659_p13  ;;  %p1680_p4 = por %p1679_p6, %p1678_p2 }
  0x2c   : > { %p1674_p1 = pneg %p1673_p10 }
  0x2e   : > { %p1681_p8 = pnand %p1680_p4, %p1674_p1 }
  0x30   : > { %1684 = shalt.err (!%p1681_p8)
}
  0x31   : > { %s1822_s24 = smov 128   ;;  %s1823_s25 = smov 8  }
  0x32   : > { %1581 = dma.hbm_to_vmem [thread:$0]  (!%p1935_p11), %s2294_s7, 256, %s1928_s19, [#allocation6], %s1822_s24, %s1822_s24, %s1823_s25  }
  0x33   : > { %p33_p2 = scmp.eq.s32.totalorder %s32_s23, 0  ;;  %p42_p1 = scmp.ne.s32.totalorder %s1815_s11, %s1811_s10 }
  0x34   : > { %p43_p4 = scmp.eq.s32.totalorder %s1819_s12, 0  ;;  %p1594_p6 = scmp.lt.s32.totalorder %s1819_s12, 2 }
  0x35   : > { %s1971_s28 = scalar_select %p33_p2, %s1815_s11, %s35_s22  }
  0x36   : > { %p44_p8 = por %p43_p4, %p42_p1  ;;  %p2296_p10 = scmp.eq.s32.totalorder %s1905_s13, 1 }
  0x37   : > { %2295 = sst [smem:[#allocation17_spill]] %s1971_s28  ;;  %s1980_s14 = sand.u32 1, %s1815_s11  }
  0x38   : > { %p1975_p12 = por %p2296_p10, %p42_p1  ;;  %s1489_s20 = sshll.u32 %s1819_s12, 10 }
  0x39   : > { %s1452_s18 = sshll.u32 %s1980_s14, 6  ;;  %s2298_s0 = sld [smem:[#allocation18_spill]] }
  0x3a   : > { %s2297_s29 = scalar_select %p1975_p12, 1, 0 }
  0x3b   : > { %s306_s22 = scalar_lea.vmem [#allocation2], %s1452_s18  ;;  %p1989_p11 = pnand %p1594_p6, %p44_p8 }
  0x3c   : > { %s313_s24 = sshll.u32 %s306_s22, 4  ;;  %s1993_s24 = int_to_ptr.vmem [resolvable:$true] %s313_s24 }
  0x3d   : > { %p1687_p0 = pneg %p1989_p11 }
  0x3f   : > { %s1987_s23 = scalar_lea.hbm %s2298_s0, %s1489_s20  ;;  %s1690_s26 = scalar_lea.hbm %s2298_s0, 2048 }
  0x40   : > { %s1685_s7 = scalar_lea.hbm %s1987_s23, 1024  ;;  %p1691_p7 = scmp.lt.u32.totalorder %s1987_s23, %s2298_s0 }
  0x41   : > { %p1686_p13 = scmp.ne.s32.totalorder %s1987_s23, %s1685_s7  ;;  %p1692_p9 = scmp.lt.u32.totalorder %s1690_s26, %s1685_s7 }
  0x42   : > { %p1694_p1 = scmp.lt.u32.totalorder %s1685_s7, %s1987_s23 }
  0x43   : > { %p1688_p3 = pnand %p1687_p0, %p1686_p13  ;;  %p1693_p2 = por %p1692_p9, %p1691_p7 }
  0x45   : > { %p1689_p5 = pneg %p1688_p3  ;;  %p1695_p4 = por %p1694_p1, %p1693_p2 }
  0x47   : > { %p1696_p6 = pnand %p1695_p4, %p1689_p5 }
  0x49   : > { %1699 = shalt.err (!%p1696_p6)
}
  0x4a   : > { %s1700_s27 = scalar_lea.vmem %s1993_s24, 1024  ;;  %s1824_s20 = smov [#allocation2]  }
  0x4b   : > { %p1701_p8 = scmp.ne.s32.totalorder %s1993_s24, %s1700_s27  ;;  %s1705_s18 = sshll.u32 %s1824_s20, 4  ;;  %s1706_s18 = int_to_ptr.vmem [resolvable:$false] %s1705_s18 }
  0x4c   : > { %s1707_s19 = scalar_lea.vmem %s1706_s18, 2048  ;;  %p1708_p3 = scmp.lt.s32.totalorder %s1993_s24, %s1706_s18 }
  0x4d   : > { %p1703_p10 = pnand %p1701_p8, %p1687_p0  ;;  %p1709_p7 = scmp.lt.s32.totalorder %s1707_s19, %s1700_s27 }
  0x4f   : > { %p1704_p13 = pneg %p1703_p10  ;;  %p1710_p9 = por %p1709_p7, %p1708_p3 }
  0x51   : > { %p1711_p2 = pnand %p1710_p9, %p1704_p13 }
  0x53   : > { %1714 = shalt.err (!%p1711_p2)
}
  0x54   : > { %s1825_s7 = smov 256   ;;  %s1826_s26 = smov 16  }
  0x55   : > { %s2300_s22 = scalar_lea.sflag [#allocation3], %s1980_s14  ;;  %s323_s20 = sand.u32 1, %s1819_s12  }
  0x56   : > { %1585 = dma.hbm_to_vmem [thread:$0]  (!%p1989_p11), %s1987_s23, 1024, %s1993_s24, %s2300_s22, %s1825_s7, %s1825_s7, %s1826_s26  }
  0x57   : > { %s1455_s0 = sshll.u32 %s1980_s14, 2  ;;  %s1490_s18 = sshll.u32 %s1819_s12, 6 }
  0x58   : > { %s327_s27 = scalar_lea.vmem [#allocation5], %s1455_s0  ;;  %s2029_s21 = scalar_lea.hbm %s2266_s1, %s1490_s18 }
  0x59   : > { %s335_s19 = sshll.u32 %s327_s27, 4  ;;  %s324_s16 = scalar_lea.sflag [#allocation6], %s323_s20  ;;  %s336_s19 = int_to_ptr.vmem [resolvable:$true] %s335_s19 }
  0x5a   : > { %s1715_s30 = scalar_lea.hbm %s2029_s21, 64  ;;  %s1720_s23 = scalar_lea.hbm %s2266_s1, 128 }
  0x5b   : > { %p1716_p5 = scmp.ne.s32.totalorder %s2029_s21, %s1715_s30  ;;  %p1721_p6 = scmp.lt.u32.totalorder %s2029_s21, %s2266_s1 }
  0x5c   : > { %p1722_p8 = scmp.lt.u32.totalorder %s1720_s23, %s1715_s30  ;;  %p1724_p13 = scmp.lt.u32.totalorder %s1715_s30, %s2029_s21 }
  0x5d   : > { %p1718_p1 = pnand %p1716_p5, %p1687_p0 }
  0x5e   : > { %p1723_p10 = por %p1722_p8, %p1721_p6 }
  0x5f   : > { %p1719_p4 = pneg %p1718_p1 }
  0x60   : > { %p1725_p3 = por %p1724_p13, %p1723_p10 }
  0x62   : > { %p1726_p7 = pnand %p1725_p3, %p1719_p4 }
  0x64   : > { %1729 = shalt.err (!%p1726_p7)
}
  0x65   : > { %s1730_s28 = scalar_lea.vmem %s336_s19, 64  ;;  %s1827_s7 = smov [#allocation5]  }
  0x66   : > { %p1731_p9 = scmp.ne.s32.totalorder %s336_s19, %s1730_s28  ;;  %s1735_s26 = sshll.u32 %s1827_s7, 4  ;;  %s1736_s26 = int_to_ptr.vmem [resolvable:$false] %s1735_s26 }
  0x67   : > { %s1737_s22 = scalar_lea.vmem %s1736_s26, 128  ;;  %p1738_p1 = scmp.lt.s32.totalorder %s336_s19, %s1736_s26 }
  0x68   : > { %p1733_p2 = pnand %p1731_p9, %p1687_p0  ;;  %p1739_p12 = scmp.lt.s32.totalorder %s1737_s22, %s1730_s28 }
  0x6a   : > { %p1734_p5 = pneg %p1733_p2  ;;  %p1740_p6 = por %p1739_p12, %p1738_p1 }
  0x6c   : > { %p1741_p8 = pnand %p1740_p6, %p1734_p5 }
  0x6e   : > { %1744 = shalt.err (!%p1741_p8)
}
  0x6f   : > { %1588 = dma.hbm_to_vmem [thread:$0]  (!%p1989_p11), %s2029_s21, 64, %s336_s19, %s324_s16  }
  0x70   : > { %p2301_p4 = scmp.ne.s32.totalorder %s2291_s17, 0 }
  0x71   : > { %s2053_s30 = sand.u32 (!%p2301_p4), 1, %s1811_s10   ;;  %p2302_p12 = scmp.ne.s32.totalorder (!%p2301_p4), %s2288_s15, 0 }
  0x72   : > { %344 = sbr.rel (%p2301_p4) target bundleno = 1990 (0x7c6), region = 56  ;;  %s1459_s20 = sshll.u32 (!%p2301_p4), %s2053_s30, 6 }
  0x73   : > { %s347_s18 = scalar_lea.sflag (!%p2301_p4), [#allocation3], %s2053_s30  ;;  %s350_s27 = scalar_lea.vmem (!%p2301_p4), [#allocation2], %s1459_s20 }
  0x79   : > { %1790 = dma.done.wait (%p2302_p12), %s347_s18, 1024  }
  0x7a   : > { %1792 = vsyncadd (%p2302_p12), %s347_s18, 4294966272  ;;  %s355_s16 = sand.u32 1, %s1905_s13   ;;  %s1460_s17 = sshll.u32 %s2053_s30, 2 }
  0x7b   : > { %s356_s21 = scalar_lea.sflag [#allocation6], %s355_s16  ;;  %s2065_s25 = scalar_lea.vmem [#allocation5], %s1460_s17 }
  0x7c   : > { %1794 = dma.done.wait (%p2302_p12), %s356_s21, 64  }
  0x7d   : > { %1796 = vsyncadd (%p2302_p12), %s356_s21, 4294967232  ;;  %p2303_p11 = scmp.eq.s32.totalorder %s1905_s13, 0 }
  0x7f   : > { %1798 = dma.done.wait (%p2303_p11), [#allocation6], 256   ;;  %p2304_p0 = pmov %p2303_p11 }
  0x80   : > { %v1828_v0 = vmov 0.0   ;;  %v1829_v1 = vmov 0   ;;  %v2076_v2 = vld [vmem:[%s350_s27 + $0x8] sm:$0xff]  ;;  %v2078_v3 = vld [vmem:[%s350_s27 + $0x18] sm:$0xff]  ;;  %v2080_v4 = vld [vmem:[%s350_s27] sm:$0xff]  ;;  %vm519_vm0 = vcmask 261120   ;;  %v416_v24 = vlaneseq }
  0x81   : > { %1800 = vsyncadd (%p2304_p0), [#allocation6], 4294967040  ;;  %596 = vmatprep.mubr.f32.mxu0 %v1828_v0  ;;  %1640 = vset.pattern.permute.xlu1 %v1829_v1  ;;  %v1530_v5 = vpack.c.bf16 %v2078_v3, %v2076_v2  ;;  %v2084_v6 = vld [vmem:[%s350_s27 + $0x10] sm:$0xff]  ;;  %v2086_v7 = vld [vmem:[%s350_s27 + $0x28] sm:$0xff]  ;;  %v1830_v22 = vmov 1983009808  }
  0x82   : > { %1639 = vset.pattern.permute.xlu0 %v1829_v1  ;;  %v2088_v8 = vld [vmem:[%s350_s27 + $0x38] sm:$0xff]  ;;  %v1532_v9 = vpack.c.bf16 %v2084_v6, %v2080_v4  ;;  %v2094_v11 = vld [vmem:[%s350_s27 + $0x20] sm:$0xff]  ;;  %v2096_v12 = vld [vmem:[%s350_s27 + $0x30] sm:$0xff]  ;;  %v414_v23 = vunpack.c.l.s4 %v1830_v22  ;;  %v2127_v26 = vshrl.u32 %v416_v24, 7  ;;  %vm423_vm1 = vcmask 1041408   ;;  %s402_s23 = scalar_lea.vmem [#allocation8], %s1459_s20 }
  0x83   : > { %v1534_v10 = vpack.c.bf16 %v2088_v8, %v2086_v7  ;;  %1531 = vmatprep.subr.bf16.mxu0 %v1530_v5  ;;  %v1536_v13 = vpack.c.bf16 %v2096_v12, %v2094_v11  ;;  %v495_v14 = vld [vmem:[%s2269_s4] sm:$0xff]  ;;  %v497_v15 = vld [vmem:[%s2269_s4 + $0x10] sm:$0xff]  ;;  %v496_v16 = vld [vmem:[%s2269_s4 + $0x8] sm:$0xff]  ;;  %vm723_vm2 = vcmask 130048   ;;  %s1343_s24 = sshll.u32 %s402_s23, 4  ;;  %s1491_s20 = sshll.u32 %s1905_s13, 10  ;;  %s2214_s24 = int_to_ptr.vmem [resolvable:$true] %s1343_s24 }
  0x84   : > { %1533 = vmatpush1.bf16.msra.mxu0 %v1532_v9  ;;  %501 = vperm.xlu1 %1640, %v495_v14   ;;  %v498_v17 = vld [vmem:[%s2269_s4 + $0x18] sm:$0xff]  ;;  %v491_v18 = vld [vmem:[%s2268_s3] sm:$0xff]  ;;  %v492_v19 = vld [vmem:[%s2268_s3 + $0x8] sm:$0xff]  ;;  %v415_v25 = vunpack.c.0.s8 %v414_v23  ;;  %v628_v23 = vsub.s32 3, %v2127_v26  ;;  %s2220_s7 = scalar_lea.hbm %s2274_s9, %s1491_s20  ;;  %s1330_s13 = scalar_lea.sflag [#allocation4], %s2053_s30 }
  0x85   : > { %1535 = vmatprep.subr.bf16.mxu0 %v1534_v10  ;;  %511 = vperm.xlu0 %1639, %v497_v15   ;;  %v493_v20 = vld [vmem:[%s2268_s3 + $0x10] sm:$0xff]  ;;  %v494_v21 = vld [vmem:[%s2268_s3 + $0x18] sm:$0xff]  ;;  %v411_v28 = vld [vmem:[%s2065_s25] sm:$0xf]  ;;  %s1745_s26 = scalar_lea.vmem %s2214_s24, 1024  ;;  %p2305_p13 = scmp.ne.s32.totalorder %s2297_s29, 0 }
  0x86   : > { %v418_v27 = vsub.s32 %v415_v25, %v2127_v26  ;;  %v645_v37 = vld [vmem:[%s2267_s2 + $0x8] sm:$0xff]  ;;  %vm1551_vm3 = vmpackc.low %vm723_vm2, %vm723_vm2  ;;  %p1746_p10 = scmp.ne.s32.totalorder %s2214_s24, %s1745_s26  ;;  %s1831_s22 = smov [#allocation8]  }
  0x87   : > { %712 = vmatprep.mubr.f32.mxu1 %v645_v37  ;;  %s1749_s18 = sshll.u32 %s1831_s22, 4  ;;  %s1750_s18 = int_to_ptr.vmem [resolvable:$false] %s1749_s18 }
  0x88   : > { %1537 = vmatpush1.bf16.msra.mxu0 %v1536_v13  ;;  %506 = vperm.xlu1 %1640, %v496_v16   ;;  %v419_v29 = vrot.slane %v411_v28, %v418_v27  ;;  %p1747_p3 = pnand %p1746_p10, %p2305_p13  ;;  %s1751_s27 = scalar_lea.vmem %s1750_s18, 2048 }
  0x89   : > { %516 = vperm.xlu0 %1639, %v498_v17   ;;  %p1752_p9 = scmp.lt.s32.totalorder %s2214_s24, %s1750_s18  ;;  %p1753_p2 = scmp.lt.s32.totalorder %s1751_s27, %s1745_s26 }
  0x8a   : > { %v420_v30 = vcombine.high %v419_v29, %v419_v29  ;;  %v424_v31 = vsel %vm423_vm1, %v419_v29, -inf  ;;  %p1748_p7 = pneg %p1747_p3 }
  0x8b   : > { %1463 = vmatmul.mubr.msk.f32.vlgmr.msra.gmra.mrb[0].mxu0 %vm519_vm0, %v491_v18  ;;  %v425_v33 = vrot.slane %v424_v31, 4  ;;  %p1754_p5 = por %p1753_p2, %p1752_p9 }
  0x8c   : > { %602 = vmatprep.mubr.f32.mxu0 %v1828_v0  ;;  %v431_v32 = vsel %vm423_vm1, %v420_v30, -inf }
  0x8d   : > { %v432_v34 = vrot.slane %v431_v32, 4  ;;  %v426_v35 = vmax.f32 %v424_v31, %v425_v33  ;;  %p1755_p1 = pnand %p1754_p5, %p1748_p7 }
  0x8f   : > { %1464 = vmatmul.mubr.msk.f32.gmra.mrb[2].mxu0 %vm519_vm0, %v492_v19  ;;  %v433_v36 = vmax.f32 %v431_v32, %v432_v34  ;;  %v427_v38 = vrot.slane %v426_v35, 2 }
  0x90   : > { %608 = vmatprep.mubr.f32.mxu0 %v1828_v0 }
  0x91   : > { %v434_v39 = vrot.slane %v433_v36, 2  ;;  %v428_v40 = vmax.f32 %v426_v35, %v427_v38 }
  0x93   : > { %1465 = vmatmul.mubr.msk.f32.gmra.mrb[4].mxu0 %vm519_vm0, %v493_v20  ;;  %v435_v41 = vmax.f32 %v433_v36, %v434_v39  ;;  %v429_v42 = vrot.slane %v428_v40, 1 }
  0x94   : > { %614 = vmatprep.mubr.f32.mxu0 %v1828_v0 }
  0x95   : > { %v436_v43 = vrot.slane %v435_v41, 1  ;;  %v430_v44 = vmax.f32 %v428_v40, %v429_v42 }
  0x97   : > { %1466 = vmatmul.mubr.msk.f32.gmra.mrb[6].mxu0 %vm519_vm0, %v494_v21  ;;  %v437_v45 = vmax.f32 %v435_v41, %v436_v43  ;;  %v624_v21 = vsub.s32 1, %v2127_v26 }
  0x99   : > { %v440_v46 = vcombine.low %v430_v44, %v437_v45 }
  0x9b   : > { %v447_v47 = vrot.slane %v440_v46, %v418_v27 }
  0x9d   : > { %v449_v48 = vsub.f32 %v411_v28, %v447_v47  ;;  %v644_v47 = vld [vmem:[%s2267_s2] sm:$0xff] }
  0x9f   : > { %v450_v49 = vmul.f32 1.442695, %v449_v48  ;;  %v647_v48 = vld [vmem:[%s2267_s2 + $0x18] sm:$0xff] }
  0xa1   : > { %1641 = vpow2.f32 %v450_v49  ;;  %v646_v49 = vld [vmem:[%s2267_s2 + $0x10] sm:$0xff] }
  0xab   : > { %v1642_v50 = vpop.eup %1641 }
  0xac   : > { %v459_v51 = vrot.slane %v1642_v50, %v418_v27 }
  0xae   : > { %v460_v52 = vcombine.high %v459_v51, %v459_v51  ;;  %v463_v53 = vsel %vm423_vm1, %v459_v51, 0.0 }
  0xaf   : > { %v464_v55 = vrot.slane %v463_v53, 4 }
  0xb0   : > { %v470_v54 = vsel %vm423_vm1, %v460_v52, 0.0 }
  0xb1   : > { %v471_v56 = vrot.slane %v470_v54, 4  ;;  %v465_v57 = vadd.f32 %v464_v55, %v463_v53 }
  0xb3   : > { %v472_v58 = vadd.f32 %v471_v56, %v470_v54  ;;  %v466_v59 = vrot.slane %v465_v57, 2 }
  0xb5   : > { %v473_v60 = vrot.slane %v472_v58, 2  ;;  %v467_v61 = vadd.f32 %v466_v59, %v465_v57 }
  0xb7   : > { %v474_v62 = vadd.f32 %v473_v60, %v472_v58  ;;  %v468_v63 = vrot.slane %v467_v61, 1 }
  0xb9   : > { %v475_v1 = vrot.slane %v474_v62, 1  ;;  %v469_v5 = vadd.f32 %v468_v63, %v467_v61 }
  0xbb   : > { %v476_v9 = vadd.f32 %v475_v1, %v474_v62 }
  0xbd   : > { %v479_v10 = vcombine.low %v469_v5, %v476_v9 }
  0xbf   : > { %v486_v13 = vrot.slane %v479_v10, %v418_v27 }
  0xc1   : > { %v487_v14 = vrot.slane %v486_v13, 7 }
  0xc3   : > { %1643 = vrcp.f32 %v487_v14 }
  0xcd   : > { %v1644_v16 = vpop.eup %1643 }
  0xce   : > { %v490_v20 = vmul.f32 %v1644_v16, %v1642_v50 }
  0xd0   : > { %v625_v27 = vrot.slane %v490_v20, %v624_v21  ;;  %v629_v29 = vrot.slane %v490_v20, %v628_v23 }
  0xd2   : > { %v635_v32 = vrot.slane %v625_v27, %v624_v21  ;;  %v639_v36 = vrot.slane %v629_v29, %v624_v21 }
 0x103   : > { %v2138_v15 = vpop.permute.xlu1 %501 }
 0x104   : > { %v512_v25 = vpop.permute.xlu0 %511 }
 0x108   : > { %v517_v33 = vpop.permute.xlu0 %516 }
 0x15e   : > { %v2140_v17 = vpop.f32.mrb[0].mxu0 }
 0x15f   : > { %v600_v18 = vpop.f32.mrb[1].mxu0 }
 0x160   : > { %v601_v19 = vadd.f32 %v600_v18, %v2138_v15 }
 0x162   : > { %v2144_v22 = vpop.f32.mrb[2].mxu0  ;;  %917 = vmatprep.mubr.f32.mxu0 %v601_v19 }
 0x163   : > { %v2147_v24 = vpop.f32.mrb[3].mxu0 }
 0x166   : > { %v610_v28 = vpop.f32.mrb[4].mxu0 }
 0x167   : > { %v612_v30 = vpop.f32.mrb[5].mxu0  ;;  %v611_v31 = vadd.f32 %v610_v28, %v512_v25 }
 0x168   : > { %v613_v34 = vadd.f32 %v612_v30, %v512_v25 }
 0x169   : > { %v640_v40 = vmul.f32 %v635_v32, %v611_v31 }
 0x16a   : > { %v616_v35 = vpop.f32.mrb[6].mxu0  ;;  %v641_v43 = vmul.f32 %v639_v36, %v613_v34 }
 0x16b   : > { %v617_v37 = vadd.f32 %v616_v35, %v517_v33  ;;  %v618_v38 = vpop.f32.mrb[7].mxu0 }
 0x16c   : > { %v619_v39 = vadd.f32 %v618_v38, %v517_v33 }
 0x16d   : > { %v642_v41 = vmul.f32 %v635_v32, %v617_v37  ;;  %v1544_v42 = vpack.c.bf16 %v617_v37, %v611_v31 }
 0x16e   : > { %v1542_v26 = vpack.c.bf16 %v619_v39, %v613_v34  ;;  %v643_v44 = vmul.f32 %v639_v36, %v619_v39 }
 0x16f   : > { %v1540_v45 = vpack.c.bf16 %v642_v41, %v640_v40 }
 0x170   : > { %v1538_v46 = vpack.c.bf16 %v643_v44, %v641_v43 }
 0x172   : > { %1539 = vmatprep.subr.bf16.mxu1 %v1538_v46 }
 0x173   : > { %1541 = vmatpush1.bf16.xpose.msra.mxu1 %v1540_v45 }
 0x174   : > { %1543 = vmatprep.subr.bf16.mxu1 %v1542_v26 }
 0x17a   : > { %713 = vmatmul.mubr.f32.vlgmr.msra.gmra.mrb[0].mxu1 %v644_v47 }
 0x17b   : > { %1545 = vmatpush1.bf16.msra.mxu1 %v1544_v42  ;;  %717 = vmatprep.mubr.f32.mxu1 %v647_v48 }
 0x17e   : > { %718 = vmatmul.mubr.f32.gmra.mrb[2].mxu1 %v646_v49 }
 0x17f   : > { %794 = vmatprep.mubr.f32.mxu1 %v1828_v0 }
 0x24d   : > { %v714_v50 = vpop.f32.mrb[0].mxu1 }
 0x24e   : > { %v716_v51 = vpop.f32.mrb[1].mxu1  ;;  %1467 = vmatmul.mubr.msk.f32.vlgmr.msra.gmra.mrb[4].mxu1 %vm723_vm2, %v714_v50 }
 0x24f   : > { %800 = vmatprep.mubr.f32.mxu1 %v1828_v0  ;;  %v928_v51 = vld [vmem:[%s2270_s5] sm:$0xff] }
 0x251   : > { %v719_v52 = vpop.f32.mrb[2].mxu1 }
 0x252   : > { %v721_v53 = vpop.f32.mrb[3].mxu1  ;;  %1468 = vmatmul.mubr.msk.f32.gmra.mrb[6].mxu1 %vm723_vm2, %v719_v52  ;;  %v929_v52 = vld [vmem:[%s2270_s5 + $0x8] sm:$0xff] }
 0x321   : > { %v796_v54 = vpop.f32.mrb[4].mxu1 }
 0x322   : > { %v798_v55 = vpop.f32.mrb[5].mxu1 }
 0x325   : > { %v802_v56 = vpop.f32.mrb[6].mxu1 }
 0x326   : > { %v807_v57 = vmax.f32 %v796_v54, %v802_v56  ;;  %v804_v58 = vpop.f32.mrb[7].mxu1 }
 0x327   : > { %v814_v59 = vmax.f32 %v798_v55, %v804_v58 }
 0x328   : > { %v808_v60 = vrot.slane %v807_v57, 4 }
 0x329   : > { %v815_v61 = vrot.slane %v814_v59, 4 }
 0x32a   : > { %v809_v62 = vmax.f32 %v807_v57, %v808_v60  ;;  %v1550_v57 = vpack.c.bf16 %v929_v52, %v928_v51 }
 0x32b   : > { %v816_v63 = vmax.f32 %v814_v59, %v815_v61  ;;  %v599_v59 = vadd.f32 %v2140_v17, %v2138_v15  ;;  %v1469_v15 = vld [vmem:[%s2271_s6] ss:$0 sm:$0xff] }
 0x32c   : > { %v810_v1 = vrot.slane %v809_v62, 2 }
 0x32d   : > { %v817_v5 = vrot.slane %v816_v63, 2 }
 0x32e   : > { %v811_v9 = vmax.f32 %v809_v62, %v810_v1 }
 0x32f   : > { %v818_v10 = vmax.f32 %v816_v63, %v817_v5 }
 0x330   : > { %v812_v13 = vrot.slane %v811_v9, 1 }
 0x331   : > { %v819_v14 = vrot.slane %v818_v10, 1 }
 0x332   : > { %v813_v16 = vmax.f32 %v811_v9, %v812_v13  ;;  %v1026_v9 = vld [vmem:[#allocation7] sm:$0xff] }
 0x333   : > { %v820_v18 = vmax.f32 %v818_v10, %v819_v14  ;;  %1517 = vmatprep.mubr.msk.f32.mxu1 %vm723_vm2, %v1026_v9 }
 0x334   : > { %v821_v19 = vsub.f32 %v796_v54, %v813_v16  ;;  %v823_v20 = vsub.f32 %v802_v56, %v813_v16 }
 0x335   : > { %v822_v21 = vsub.f32 %v798_v55, %v820_v18  ;;  %v824_v23 = vsub.f32 %v804_v58, %v820_v18  ;;  %v507_v58 = vpop.permute.xlu1 %506  ;;  %v1027_v18 = vld [vmem:[#allocation7 + $0x8] sm:$0xff] }
 0x336   : > { %v825_v25 = vmul.f32 1.442695, %v821_v19  ;;  %v829_v27 = vmul.f32 1.442695, %v823_v20  ;;  %v607_v60 = vadd.f32 %v2147_v24, %v507_v58  ;;  %v605_v61 = vadd.f32 %v2144_v22, %v507_v58  ;;  %v1111_v19 = vld [vmem:[%s2273_s8] sm:$0xff] }
 0x337   : > { %v827_v28 = vmul.f32 1.442695, %v822_v21  ;;  %v831_v29 = vmul.f32 1.442695, %v824_v23 }
 0x338   : > { %1645 = vpow2.f32 %v825_v25 }
 0x339   : > { %1647 = vpow2.f32 %v829_v27 }
 0x33a   : > { %1649 = vpow2.f32 %v827_v28  ;;  %v1112_v28 = vld [vmem:[%s2273_s8 + $0x8] sm:$0xff] }
 0x33b   : > { %1651 = vpow2.f32 %v831_v29  ;;  %v1113_v29 = vld [vmem:[%s2273_s8 + $0x10] sm:$0xff] }
 0x342   : > { %v1646_v30 = vpop.eup %1645 }
 0x343   : > { %v1648_v31 = vpop.eup %1647 }
 0x344   : > { %v1650_v32 = vpop.eup %1649  ;;  %v833_v33 = vadd.f32 %v1648_v31, %v1646_v30 }
 0x345   : > { %v1652_v34 = vpop.eup %1651 }
 0x346   : > { %v834_v35 = vrot.slane %v833_v33, 4  ;;  %v840_v36 = vadd.f32 %v1652_v34, %v1650_v32 }
 0x348   : > { %v835_v37 = vadd.f32 %v834_v35, %v833_v33  ;;  %v841_v38 = vrot.slane %v840_v36, 4 }
 0x34a   : > { %v836_v39 = vrot.slane %v835_v37, 2  ;;  %v842_v40 = vadd.f32 %v841_v38, %v840_v36 }
 0x34c   : > { %v837_v41 = vadd.f32 %v836_v39, %v835_v37  ;;  %v843_v42 = vrot.slane %v842_v40, 2 }
 0x34e   : > { %v838_v26 = vrot.slane %v837_v41, 1  ;;  %v844_v43 = vadd.f32 %v843_v42, %v842_v40 }
 0x350   : > { %v839_v44 = vadd.f32 %v838_v26, %v837_v41  ;;  %v845_v45 = vrot.slane %v844_v43, 1 }
 0x352   : > { %1653 = vrcp.f32 %v839_v44  ;;  %v846_v46 = vadd.f32 %v845_v45, %v844_v43 }
 0x354   : > { %1655 = vrcp.f32 %v846_v46 }
 0x35c   : > { %v1654_v47 = vpop.eup %1653 }
 0x35d   : > { %v848_v48 = vmul.f32 %v1654_v47, %v1646_v30  ;;  %v851_v49 = vmul.f32 %v1654_v47, %v1648_v31  ;;  %v1114_v30 = vld [vmem:[%s2273_s8 + $0x18] sm:$0xff] }
 0x35e   : > { %v1656_v50 = vpop.eup %1655 }
 0x35f   : > { %v850_v53 = vmul.f32 %v1656_v50, %v1650_v32  ;;  %v852_v54 = vmul.f32 %v1656_v50, %v1652_v34  ;;  %v1548_v55 = vpack.c.bf16 %v851_v49, %v848_v48 }
 0x361   : > { %v1546_v56 = vpack.c.bf16 %v852_v54, %v850_v53 }
 0x363   : > { %1547 = vmatprep.subr.bf16.mxu0 %v1546_v56 }
 0x364   : > { %1549 = vmatpush1.bf16.xpose.msra.mxu0 %v1548_v55 }
 0x365   : > { %1552 = vmatprep.subr.msk.bf16.mxu0 %vm1551_vm3, %v1550_v57 }
 0x36b   : > { %918 = vmatmul.mubr.f32.vlgmr.msra.gmra.mrb[8].mxu0 %v599_v59 }
 0x36c   : > { %922 = vmatprep.mubr.f32.mxu0 %v607_v60  ;;  %1555 = vmatpush3.bf16.xpose.msk.msra.mxu0 %vm1551_vm3, %v1550_v57 }
 0x36f   : > { %923 = vmatmul.mubr.f32.gmra.mrb[10].mxu0 %v605_v61 }
 0x43e   : > { %v919_v62 = vpop.f32.mrb[8].mxu0 }
 0x43f   : > { %v921_v63 = vpop.f32.mrb[9].mxu0  ;;  %1510 = vmatprep.mubr.msk.f32.mxu0 %vm723_vm2, %v919_v62 }
 0x442   : > { %v924_v1 = vpop.f32.mrb[10].mxu0 }
 0x443   : > { %v926_v5 = vpop.f32.mrb[11].mxu0  ;;  %1511 = vmatmul.mubr.msk.f32.vlgmr.msra.gmra.mrb[12].mxu0 %vm723_vm2, %v924_v1 }
 0x444   : > { %1524 = vmatprep.mubr.msk.f32.mxu0 %vm723_vm2, %v1111_v19 }
 0x516   : > { %v1512_v17 = vpop.f32.mrb[12].mxu0 }
 0x517   : > { %v1021_v24 = vadd.f32 %v1512_v17, %v1469_v15  ;;  %v1015_v10 = vpop.f32.mrb[13].mxu0 }
 0x518   : > { %v1016_v22 = vadd.f32 %v1469_v15, %v1015_v10 }
 0x519   : > { %v1025_v13 = vsub.f32 %v1021_v24, %v924_v1 }
 0x51a   : > { %v1024_v14 = vsub.f32 %v1016_v22, %v919_v62 }
 0x51c   : > { %v1556_v16 = vpack.c.bf16 %v1025_v13, %v1024_v14 }
 0x51e   : > { %1557 = vmatprep.subr.bf16.mxu1 %v1556_v16 }
 0x51f   : > { %1559 = vmatpush3.bf16.msra.mxu1 %v1556_v16 }
 0x520   : > { %1565 = vmatprep.subr.bf16.mxu1 %v1546_v56 }
 0x522   : > { %1518 = vmatmul.mubr.msk.f32.vlgmr.msra.gmra.mrb[8].mxu1 %vm723_vm2, %v1027_v18 }
 0x523   : > { %1567 = vmatpush1.bf16.msra.mxu1 %v1548_v55  ;;  %1288 = vmatprep.mubr.f32.mxu1 %v1828_v0 }
 0x5f5   : > { %v1519_v20 = vpop.f32.mrb[8].mxu1 }
 0x5f6   : > { %v1110_v21 = vmax.f32 %v1519_v20, 0.0  ;;  %v1100_v23 = vpop.f32.mrb[9].mxu1 }
 0x5f7   : > { %v1109_v25 = vmax.f32 %v1100_v23, 0.0 }
 0x5f9   : > { %v1560_v27 = vpack.c.bf16 %v1110_v21, %v1109_v25 }
 0x5fb   : > { %1561 = vmatprep.subr.bf16.mxu0 %v1560_v27 }
 0x5fc   : > { %1563 = vmatpush3.bf16.msra.mxu0 %v1560_v27 }
 0x5ff   : > { %1525 = vmatmul.mubr.msk.f32.vlgmr.msra.gmra.mrb[14].mxu0 %vm723_vm2, %v1112_v28 }
 0x600   : > { %1527 = vmatprep.mubr.msk.f32.mxu0 %vm723_vm2, %v1113_v29 }
 0x603   : > { %1528 = vmatmul.mubr.msk.f32.gmra.mrb[16].mxu0 %vm723_vm2, %v1114_v30 }
 0x6d2   : > { %v1526_v31 = vpop.f32.mrb[14].mxu0 }
 0x6d3   : > { %v1193_v32 = vpop.f32.mrb[15].mxu0 }
 0x6d4   : > { %1480 = vmatmul.mubr.msk.f32.vlgmr.msra.gmra.mrb[10].mxu1 %vm723_vm2, %v1193_v32 }
 0x6d5   : > { %1294 = vmatprep.mubr.f32.mxu1 %v1828_v0 }
 0x6d6   : > { %v1529_v33 = vpop.f32.mrb[16].mxu0 }
 0x6d7   : > { %v1203_v34 = vpop.f32.mrb[17].mxu0 }
 0x6d8   : > { %1481 = vmatmul.mubr.msk.f32.gmra.mrb[12].mxu1 %vm723_vm2, %v1526_v31 }
 0x6d9   : > { %1300 = vmatprep.mubr.f32.mxu1 %v1828_v0 }
 0x6dc   : > { %1482 = vmatmul.mubr.msk.f32.gmra.mrb[14].mxu1 %vm723_vm2, %v1203_v34 }
 0x6dd   : > { %1306 = vmatprep.mubr.f32.mxu1 %v1828_v0 }
 0x6e0   : > { %1483 = vmatmul.mubr.msk.f32.gmra.mrb[16].mxu1 %vm723_vm2, %v1529_v33 }
 0x7a7   : > { %v1290_v35 = vpop.f32.mrb[10].mxu1 }
 0x7a8   : > { %v1313_v36 = vadd.f32 %v1290_v35, %v2080_v4  ;;  %v1292_v37 = vpop.f32.mrb[11].mxu1 }
 0x7a9   : > { %v1314_v38 = vadd.f32 %v1292_v37, %v2076_v2 }
 0x7aa   : > { %1321 = vst [vmem:[%s402_s23] sm:$0xff] %v1313_v36 }
 0x7ab   : > { %1322 = vst [vmem:[%s402_s23 + $0x8] sm:$0xff] %v1314_v38  ;;  %v1296_v39 = vpop.f32.mrb[12].mxu1 }
 0x7ac   : > { %v1315_v40 = vadd.f32 %v1296_v39, %v2084_v6  ;;  %v1298_v41 = vpop.f32.mrb[13].mxu1 }
 0x7ad   : > { %v1316_v42 = vadd.f32 %v1298_v41, %v2078_v3 }
 0x7ae   : > { %1323 = vst [vmem:[%s402_s23 + $0x10] sm:$0xff] %v1315_v40 }
 0x7af   : > { %1324 = vst [vmem:[%s402_s23 + $0x18] sm:$0xff] %v1316_v42  ;;  %v1302_v0 = vpop.f32.mrb[14].mxu1 }
 0x7b0   : > { %v1317_v4 = vadd.f32 %v1302_v0, %v2094_v11  ;;  %v1304_v26 = vpop.f32.mrb[15].mxu1 }
 0x7b1   : > { %v1318_v2 = vadd.f32 %v1304_v26, %v2086_v7 }
 0x7b2   : > { %1325 = vst [vmem:[%s402_s23 + $0x20] sm:$0xff] %v1317_v4 }
 0x7b3   : > { %1326 = vst [vmem:[%s402_s23 + $0x28] sm:$0xff] %v1318_v2  ;;  %v1308_v6 = vpop.f32.mrb[16].mxu1 }
 0x7b4   : > { %v1319_v3 = vadd.f32 %v1308_v6, %v2096_v12  ;;  %v1310_v43 = vpop.f32.mrb[17].mxu1 }
 0x7b5   : > { %v1320_v11 = vadd.f32 %v1310_v43, %v2088_v8 }
 0x7b6   : > { %1327 = vst [vmem:[%s402_s23 + $0x30] sm:$0xff] %v1319_v3 }
 0x7b7   : > { %1328 = vst [vmem:[%s402_s23 + $0x38] sm:$0xff] %v1320_v11 }
 0x7b8   : > { %1758 = shalt.err (!%p1755_p1)
}
 0x7b9   : > { %s1759_s16 = scalar_lea.hbm %s2220_s7, 1024  ;;  %s1763_s15 = scalar_lea.hbm %s2274_s9, 2048 }
 0x7ba   : > { %p1760_p6 = scmp.ne.s32.totalorder %s2220_s7, %s1759_s16  ;;  %p1764_p12 = scmp.lt.u32.totalorder %s2220_s7, %s2274_s9 }
 0x7bb   : > { %p1765_p11 = scmp.lt.u32.totalorder %s1763_s15, %s1759_s16  ;;  %p1767_p10 = scmp.lt.u32.totalorder %s1759_s16, %s2220_s7 }
 0x7bc   : > { %p1761_p8 = pnand %p1760_p6, %p2305_p13 }
 0x7bd   : > { %p1766_p0 = por %p1765_p11, %p1764_p12 }
 0x7be   : > { %p1762_p4 = pneg %p1761_p8 }
 0x7bf   : > { %p1768_p3 = por %p1767_p10, %p1766_p0 }
 0x7c1   : > { %p1769_p7 = pnand %p1768_p3, %p1762_p4 }
 0x7c3   : > { %1772 = shalt.err (!%p1769_p7)
}
 0x7c4   : > { %s1832_s14 = smov 256   ;;  %s1833_s0 = smov 16  }
 0x7c5   : > { %1576 = dma.vmem_to_hbm [thread:$0]  (%p2305_p13), %s2214_s24, 1024, %s2220_s7, %s1330_s13, %s1832_s14, %s1832_s14, %s1833_s0  }
 0x7c6 PF: > { %s2306_s23 = sld [smem:[#allocation13_spill]]  ;;  %s2307_s20 = sld [smem:[#allocation15_spill]] }
 0x7c7   : > { %p2309_p2 = scmp.ge.s32.totalorder %s1819_s12, 2 }
 0x7cc   : > { %s1358_s11 = sand.u32 1, %s2306_s23   ;;  %p2308_p9 = scmp.ne.s32.totalorder %s2307_s20, 0 }
 0x7cd   : > { %s1359_s28 = scalar_lea.sflag [#allocation4], %s1358_s11 }
 0x7ce   : > { %p1590_p5 = pnand %p2309_p2, %p2308_p9 }
 0x7d0   : > { %1802 = dma.done.wait (!%p1590_p5), %s1359_s28, 1024  }
 0x7d1   : > { %1804 = vsyncadd (!%p1590_p5), %s1359_s28, 4294966272  ;;  %s2310_s12 = sld [smem:[#allocation16_spill]]  ;;  %s2311_s26 = sld [smem:[#allocation14_spill]] }
 0x7d2   : > { %s2312_s11 = sld [smem:[#allocation17_spill]]  ;;  %s2313_s30 = smov %s1811_s10 }
 0x7d7   : > { %p25_p1 = scmp.ge.s32.totalorder %s2310_s12, 4   ;;  %s2314_s10 = smov %s2311_s26 }
 0x7d9   :  { %27 = sbr.rel (!%p25_p1) target bundleno = 10 (0xa), region = 118 }
 0x7e0   :  { %1364 = vsyncpa [#allocation3], 1 }
 0x7e1   :  { %1366 = vsyncpa [#allocation3 + $0x1], 1 }
 0x7e2   :  { %1367 = vsyncpa [#allocation6], 1 }
 0x7e3   :  { %1369 = vsyncpa [#allocation6 + $0x1], 1 }
 0x7e4   :  { %1370 = vsyncpa [#allocation4], 1 }
 0x7e5   :  { %1372 = vsyncpa [#allocation4 + $0x1], 1 }

</bundles_post_ra>
